<compile_context>
chip_gen: v6e
topology: v6e:2x2x1
jax: 0.10.0
libtpu: 0.0.40
codegen_flags: <defaults>
</compile_context>

<pallas_src>
import functools

import jax
import jax.numpy as jnp
from jax.experimental import pallas as pl
from jax.experimental.pallas import tpu as pltpu

LANES = 128
SUBLANES = 8
_ARBITRARY = getattr(pltpu, "ARBITRARY", "arbitrary")
_CORE_PARALLEL = getattr(pltpu, "CORE_PARALLEL", None)


def _chip_config():
    """Generation-aware tiling / VMEM knobs (conservative fallback on unknown)."""
    kind = ""
    try:
        kind = jax.devices()[0].device_kind.lower()
    except Exception:  # defensive: never fail kernel launch on detection
        pass
    if "v7" in kind or "7x" in kind:
        # v7x: 2 TCs/chip, 64 MiB physical VMEM/TC, ~3.2 TB/s HBM per TC.
        # 8192x128 f32 tiles -> 2 inputs x 2 pipeline buffers x 4 MiB = 16 MiB.
        return {"max_tile_rows": 8192, "num_tc": 2, "vmem_limit": 40 * 1024 * 1024}
    if "v6" in kind:
        # v6e: 1 TC, 128 MiB VMEM, ~1.4 TB/s HBM.
        return {"max_tile_rows": 8192, "num_tc": 1, "vmem_limit": 64 * 1024 * 1024}
    # v5e / unknown: 16 MiB default scoped VMEM, ~0.8 TB/s HBM -> 2 MiB buffers.
    return {"max_tile_rows": 4096, "num_tc": 1, "vmem_limit": 32 * 1024 * 1024}


def _rmse_kernel(o_ref, l_ref, out_ref, *, valid_rows, inner_blocks, tile_rows, fold4):
    c = pl.program_id(0)  # core-split axis (CORE_PARALLEL on v7x, size 1 otherwise)
    i = pl.program_id(1)  # reduction axis ("arbitrary"); out block stays resident

    @pl.when(i == 0)
    def _():
        out_ref[...] = jnp.zeros_like(out_ref)

    # 255 scale is factored out of the per-element path (applied once in wrapper).
    o = jnp.clip(o_ref[...].astype(jnp.float32), 0.0, 1.0)
    l = jnp.clip(l_ref[...].astype(jnp.float32), 0.0, 1.0)
    err = o - l
    sq = err * err

    def fold(x):
        # Fold (tile_rows, 128) -> (8, 128) with pure VPU adds.  For big tiles
        # use 4 independent accumulation chains to break the serial vadd chain.
        if fold4:
            part = jnp.sum(
                x.reshape(tile_rows // (4 * SUBLANES), 4, SUBLANES, LANES), axis=0
            )
            return (part[0] + part[1]) + (part[2] + part[3])
        return jnp.sum(x.reshape(tile_rows // SUBLANES, SUBLANES, LANES), axis=0)

    block_idx = c * inner_blocks + i
    row_start = block_idx * tile_rows
    is_interior = row_start + tile_rows <= valid_rows

    @pl.when(is_interior)
    def _():
        # Hot path: no iota / compare / select on interior tiles.
        out_ref[...] += fold(sq)

    @pl.when(jnp.logical_not(is_interior))
    def _():
        # Ragged last tile and clamped phantom blocks: mask rows past the true
        # extent.  Keep the select form so OOB garbage / NaN cannot propagate.
        row_ids = row_start + jax.lax.broadcasted_iota(jnp.int32, sq.shape, 0)
        out_ref[...] += fold(jnp.where(row_ids < valid_rows, sq, 0.0))


def loss_rmse(outputs, label):
    """Pallas TPU implementation of Loss_RMSE.forward.

    rmse = sqrt(mean((clamp(outputs,0,1)*255 - clamp(label,0,1)*255)**2))
    Returns a scalar float32.
    """
    assert outputs.shape == label.shape
    n = outputs.size
    cfg = _chip_config()

    o_flat = outputs.reshape(-1)
    l_flat = label.reshape(-1)

    rows = n // LANES          # lane-aligned prefix goes through the kernel
    n_main = rows * LANES
    tail = n - n_main          # <= 127 elements handled by fused jnp below

    total = jnp.float32(0.0)

    if rows > 0:
        if tail:
            o2d = o_flat[:n_main].reshape(rows, LANES)
            l2d = l_flat[:n_main].reshape(rows, LANES)
        else:
            o2d = o_flat.reshape(rows, LANES)  # pure bitcast reshape, no copy
            l2d = l_flat.reshape(rows, LANES)

        tile_rows = min(
            cfg["max_tile_rows"], ((rows + SUBLANES - 1) // SUBLANES) * SUBLANES
        )
        num_blocks = pl.cdiv(rows, tile_rows)

        # Second core split only where a second TensorCore exists (v7x).
        if cfg["num_tc"] >= 2 and num_blocks >= 2 and _CORE_PARALLEL is not None:
            num_splits = 2
            lead_sem = _CORE_PARALLEL
        else:
            num_splits = 1
            lead_sem = _ARBITRARY
        inner = pl.cdiv(num_blocks, num_splits)

        def in_map(c, i):
            # Clamp so the phantom block (odd num_blocks, second split) stays in
            # bounds; its contribution is masked to zero inside the kernel.
            return (jnp.minimum(c * inner + i, num_blocks - 1), 0)

        kernel = functools.partial(
            _rmse_kernel,
            valid_rows=rows,
            inner_blocks=inner,
            tile_rows=tile_rows,
            fold4=(tile_rows % (4 * SUBLANES) == 0),
        )

        itemsize = jnp.dtype(outputs.dtype).itemsize
        partials = pl.pallas_call(
            kernel,
            out_shape=jax.ShapeDtypeStruct(
                (num_splits * SUBLANES, LANES), jnp.float32
            ),
            grid_spec=pltpu.PrefetchScalarGridSpec(
                num_scalar_prefetch=0,
                grid=(num_splits, inner),
                in_specs=[
                    pl.BlockSpec((tile_rows, LANES), in_map),
                    pl.BlockSpec((tile_rows, LANES), in_map),
                ],
                out_specs=pl.BlockSpec((SUBLANES, LANES), lambda c, i: (c, 0)),
            ),
            compiler_params=pltpu.CompilerParams(
                dimension_semantics=(lead_sem, _ARBITRARY),
                vmem_limit_bytes=cfg["vmem_limit"],
            ),
            cost_estimate=pl.CostEstimate(
                flops=8 * n_main,
                transcendentals=0,
                bytes_accessed=2 * n_main * itemsize
                + num_splits * SUBLANES * LANES * 4,
            ),
        )(o2d, l2d)
        total = total + jnp.sum(partials)

    if tail:
        d = (
            jnp.clip(o_flat[n_main:].astype(jnp.float32), 0.0, 1.0)
            - jnp.clip(l_flat[n_main:].astype(jnp.float32), 0.0, 1.0)
        )
        total = total + jnp.sum(d * d)

    # 255 factored out of the per-element path: 255 * sqrt(sum / n).
    return jnp.float32(255.0) * jnp.sqrt(total / jnp.float32(n))


def _reference_rmse(outputs, label):
    o = jnp.clip(outputs.astype(jnp.float32), 0.0, 1.0) * 255.0
    l = jnp.clip(label.astype(jnp.float32), 0.0, 1.0) * 255.0
    return jnp.sqrt(jnp.mean((o - l) ** 2))


if __name__ == "__main__":
    key = jax.random.PRNGKey(0)
    k1, k2 = jax.random.split(key)
    # NCHW inputs, same shape (the module asserts equality).
    x = jax.random.uniform(k1, (2, 4, 16, 16), jnp.float32, minval=-0.2, maxval=1.2)
    y = jax.random.uniform(k2, (2, 4, 16, 16), jnp.float32, minval=-0.2, maxval=1.2)

    rmse = jax.block_until_ready(loss_rmse(x, y))
    ref = jax.block_until_ready(_reference_rmse(x, y))

    assert jnp.allclose(rmse, ref, rtol=1e-5, atol=1e-4), (rmse, ref)
    print("KERNEL_OK")
</pallas_src>

<mosaic_0001>
module attributes {stable_mosaic.version = 11 : i64} {
  func.func @_rmse_kernel(%arg0: i32, %arg1: i32, %arg2: memref<16x128xf32, #tpu.memory_space<vmem>>, %arg3: memref<16x128xf32, #tpu.memory_space<vmem>>, %arg4: memref<8x128xf32, #tpu.memory_space<vmem>>) attributes {dimension_semantics = [#tpu.dimension_semantics<arbitrary>, #tpu.dimension_semantics<arbitrary>], iteration_bounds = array<i64: 1, 1>, scalar_prefetch = 0 : i64, scratch_operands = 0 : i64, tpu.core_type = #tpu.core_type<tc>, window_params = [{transform_indices = @transform_0, window_bounds = array<i64: 16, 128>}, {transform_indices = @transform_1, window_bounds = array<i64: 16, 128>}, {transform_indices = @transform_2, window_bounds = array<i64: 8, 128>}]} {
    %c0_i32 = arith.constant 0 : i32
    %0 = arith.cmpi eq, %arg1, %c0_i32 : i32
    %1 = arith.extui %0 : i1 to i32
    %c0_i32_0 = arith.constant 0 : i32
    %2 = arith.cmpi ne, %1, %c0_i32_0 : i32
    scf.if %2 {
      %cst_11 = arith.constant 0.000000e+00 : f32
      %25 = vector.broadcast %cst_11 : f32 to vector<8x128xf32>
      %c0_12 = arith.constant 0 : index
      %c0_13 = arith.constant 0 : index
      %26 = vector.load %arg4[%c0_12, %c0_13] : memref<8x128xf32, #tpu.memory_space<vmem>>, vector<8x128xf32>
      tpu.vector_store %arg4[%c0_12, %c0_13], %25 {strides = array<i32>} : memref<8x128xf32, #tpu.memory_space<vmem>>, vector<8x128xf32>,
    } else {
    }
    %c0 = arith.constant 0 : index
    %c0_1 = arith.constant 0 : index
    %3 = vector.load %arg2[%c0, %c0_1] : memref<16x128xf32, #tpu.memory_space<vmem>>, vector<16x128xf32>
    %cst = arith.constant 0.000000e+00 : f32
    %cst_2 = arith.constant 1.000000e+00 : f32
    %4 = vector.broadcast %cst : f32 to vector<16x128xf32>
    %5 = arith.maximumf %4, %3 : vector<16x128xf32>
    %6 = vector.broadcast %cst_2 : f32 to vector<16x128xf32>
    %7 = arith.minimumf %6, %5 : vector<16x128xf32>
    %c0_3 = arith.constant 0 : index
    %c0_4 = arith.constant 0 : index
    %8 = vector.load %arg3[%c0_3, %c0_4] : memref<16x128xf32, #tpu.memory_space<vmem>>, vector<16x128xf32>
    %cst_5 = arith.constant 0.000000e+00 : f32
    %cst_6 = arith.constant 1.000000e+00 : f32
    %9 = vector.broadcast %cst_5 : f32 to vector<16x128xf32>
    %10 = arith.maximumf %9, %8 : vector<16x128xf32>
    %11 = vector.broadcast %cst_6 : f32 to vector<16x128xf32>
    %12 = arith.minimumf %11, %10 : vector<16x128xf32>
    %13 = arith.subf %7, %12 : vector<16x128xf32>
    %14 = arith.mulf %13, %13 : vector<16x128xf32>
    %c1_i32 = arith.constant 1 : i32
    %15 = arith.muli %arg0, %c1_i32 : i32
    %16 = arith.addi %15, %arg1 : i32
    %c16_i32 = arith.constant 16 : i32
    %17 = arith.muli %16, %c16_i32 : i32
    %c16_i32_7 = arith.constant 16 : i32
    %18 = arith.addi %17, %c16_i32_7 : i32
    %c16_i32_8 = arith.constant 16 : i32
    %19 = arith.cmpi sle, %18, %c16_i32_8 : i32
    %20 = arith.extui %19 : i1 to i32
    %c0_i32_9 = arith.constant 0 : i32
    %21 = arith.cmpi ne, %20, %c0_i32_9 : i32
    scf.if %21 {
      %c0_11 = arith.constant 0 : index
      %c0_12 = arith.constant 0 : index
      %25 = vector.load %arg4[%c0_11, %c0_12] : memref<8x128xf32, #tpu.memory_space<vmem>>, vector<8x128xf32>
      %26 = vector.shape_cast %14 : vector<16x128xf32> to vector<2x8x128xf32>
      %cst_13 = arith.constant dense<0.000000e+00> : vector<8x128xf32>
      %27 = vector.multi_reduction <add>, %26, %cst_13 [0] : vector<2x8x128xf32> to vector<8x128xf32>
      %28 = arith.addf %25, %27 : vector<8x128xf32>
      %c0_14 = arith.constant 0 : index
      %c0_15 = arith.constant 0 : index
      %29 = vector.load %arg4[%c0_14, %c0_15] : memref<8x128xf32, #tpu.memory_space<vmem>>, vector<8x128xf32>
      tpu.vector_store %arg4[%c0_14, %c0_15], %28 {strides = array<i32>} : memref<8x128xf32, #tpu.memory_space<vmem>>, vector<8x128xf32>,
    } else {
    }
    %true = arith.constant true
    %22 = arith.xori %19, %true : i1
    %23 = arith.extui %22 : i1 to i32
    %c0_i32_10 = arith.constant 0 : i32
    %24 = arith.cmpi ne, %23, %c0_i32_10 : i32
    scf.if %24 {
      %25 = tpu.iota {dimensions = array<i32: 0>} : vector<16x128xi32>
      %26 = vector.broadcast %17 : i32 to vector<16x128xi32>
      %27 = arith.addi %26, %25 : vector<16x128xi32>
      %c0_11 = arith.constant 0 : index
      %c0_12 = arith.constant 0 : index
      %28 = vector.load %arg4[%c0_11, %c0_12] : memref<8x128xf32, #tpu.memory_space<vmem>>, vector<8x128xf32>
      %c16_i32_13 = arith.constant 16 : i32
      %29 = vector.broadcast %c16_i32_13 : i32 to vector<16x128xi32>
      %30 = arith.cmpi slt, %27, %29 : vector<16x128xi32>
      %cst_14 = arith.constant 0.000000e+00 : f32
      %31 = vector.broadcast %cst_14 : f32 to vector<16x128xf32>
      %32 = arith.select %30, %14, %31 : vector<16x128xi1>, vector<16x128xf32>
      %33 = vector.shape_cast %32 : vector<16x128xf32> to vector<2x8x128xf32>
      %cst_15 = arith.constant dense<0.000000e+00> : vector<8x128xf32>
      %34 = vector.multi_reduction <add>, %33, %cst_15 [0] : vector<2x8x128xf32> to vector<8x128xf32>
      %35 = arith.addf %28, %34 : vector<8x128xf32>
      %c0_16 = arith.constant 0 : index
      %c0_17 = arith.constant 0 : index
      %36 = vector.load %arg4[%c0_16, %c0_17] : memref<8x128xf32, #tpu.memory_space<vmem>>, vector<8x128xf32>
      tpu.vector_store %arg4[%c0_16, %c0_17], %35 {strides = array<i32>} : memref<8x128xf32, #tpu.memory_space<vmem>>, vector<8x128xf32>,
    } else {
    }
    return
  }
  func.func @transform_0(%arg0: i32, %arg1: i32) -> (i32, i32) {
    %c1_i32 = arith.constant 1 : i32
    %0 = arith.muli %arg0, %c1_i32 : i32
    %1 = arith.addi %0, %arg1 : i32
    %c0_i32 = arith.constant 0 : i32
    %2 = arith.minsi %1, %c0_i32 : i32
    %c0_i32_0 = arith.constant 0 : i32
    %c0_i32_1 = arith.constant 0 : i32
    return %2, %c0_i32_0 : i32, i32
  }
  func.func @transform_1(%arg0: i32, %arg1: i32) -> (i32, i32) {
    %c1_i32 = arith.constant 1 : i32
    %0 = arith.muli %arg0, %c1_i32 : i32
    %1 = arith.addi %0, %arg1 : i32
    %c0_i32 = arith.constant 0 : i32
    %2 = arith.minsi %1, %c0_i32 : i32
    %c0_i32_0 = arith.constant 0 : i32
    %c0_i32_1 = arith.constant 0 : i32
    return %2, %c0_i32_0 : i32, i32
  }
  func.func @transform_2(%arg0: i32, %arg1: i32) -> (i32, i32) {
    %c0_i32 = arith.constant 0 : i32
    %c0_i32_0 = arith.constant 0 : i32
    return %arg0, %c0_i32 : i32, i32
  }
}

</mosaic_0001>

<bundles_post_ra>
// kernel: tpu_custom_call.1
= control target key start
LH: loop header
LB: loop body
LE: loop exit
PB: predicated region body
PF: predicated region fallthrough
CT: control target
= control target key end

     0   :  { %7 = vsyncpa [#allocation3], 0  ;;  %s231_s0 = inlined_call_operand.hbm [shape: f32[16,128], index: 0, kind: input, shape index: {}]   ;;  %s232_s1 = inlined_call_operand.hbm [shape: f32[16,128], index: 1, kind: input, shape index: {}]   ;;  %s233_s2 = inlined_call_operand.hbm [shape: f32[8,128], index: 2, kind: output, shape index: {}]  }
   0x1   :  { %8 = vsyncpa [#allocation6], 0 }
   0x2   :  { %9 = vsyncpa [#allocation4], 0  ;;  %s202_s9 = smov [#allocation2]  }
   0x3   :  { %s21_s10 = sshll.u32 %s202_s9, 4  ;;  %s22_s10 = int_to_ptr.vmem [resolvable:$true] %s21_s10 }
   0x4   :  { %s144_s11 = scalar_lea.vmem %s22_s10, 256  ;;  %p149_p1 = scmp.lt.s32.totalorder %s22_s10, %s22_s10 }
   0x5   :  { %p145_p0 = scmp.ne.s32.totalorder %s22_s10, %s144_s11  ;;  %p150_p2 = scmp.lt.s32.totalorder %s144_s11, %s144_s11 }
   0x7   :  { %p151_p3 = por %p150_p2, %p149_p1 }
   0x9   :  { %p152_p4 = pnand %p151_p3, %p145_p0 }
   0xb   :  { %155 = shalt.err (!%p152_p4)
}
   0xc   :  { %s203_s12 = smov 128   ;;  %s204_s13 = smov 8  }
   0xd   :  { %27 = dma.hbm_to_vmem [thread:$0]  %s231_s0, 256, %s22_s10, [#allocation3], %s203_s12, %s203_s12, %s204_s13  }
   0xe   :  { %s205_s16 = smov [#allocation5]  }
   0xf   :  { %s39_s17 = sshll.u32 %s205_s16, 4  ;;  %s40_s17 = int_to_ptr.vmem [resolvable:$true] %s39_s17 }
  0x10   :  { %s164_s18 = scalar_lea.vmem %s40_s17, 256  ;;  %p169_p6 = scmp.lt.s32.totalorder %s40_s17, %s40_s17 }
  0x11   :  { %p165_p5 = scmp.ne.s32.totalorder %s40_s17, %s164_s18  ;;  %p170_p7 = scmp.lt.s32.totalorder %s164_s18, %s164_s18 }
  0x13   :  { %p171_p8 = por %p170_p7, %p169_p6 }
  0x15   :  { %p172_p9 = pnand %p171_p8, %p165_p5 }
  0x17   :  { %175 = shalt.err (!%p172_p9)
}
  0x18   :  { %45 = dma.hbm_to_vmem [thread:$0]  %s232_s1, 256, %s40_s17, [#allocation6], %s203_s12, %s203_s12, %s204_s13  }
  0x19   :  { %196 = dma.done.wait [#allocation3], 256  }
  0x1a   :  { %197 = vsyncadd [#allocation3], 4294967040 }
  0x1b   :  { %198 = dma.done.wait [#allocation6], 256  }
  0x1c   :  { %199 = vsyncadd [#allocation6], 4294967040  ;;  %v65_v0 = vld [vmem:[#allocation2] sm:$0xff]  ;;  %v66_v1 = vld [vmem:[#allocation2 + $0x8] sm:$0xff]  ;;  %s206_s0 = smov [#allocation7]  }
  0x1d   :  { %v71_v2 = vld [vmem:[#allocation5] sm:$0xff]  ;;  %v67_v3 = vmax.f32 %v65_v0, 0.0  ;;  %v68_v4 = vmax.f32 %v66_v1, 0.0  ;;  %v72_v5 = vld [vmem:[#allocation5 + $0x8] sm:$0xff]  ;;  %s116_s1 = sshll.u32 %s206_s0, 4  ;;  %s117_s1 = int_to_ptr.vmem [resolvable:$true] %s116_s1 }
  0x1e   :  { %v73_v6 = vmax.f32 %v71_v2, 0.0  ;;  %v74_v7 = vmax.f32 %v72_v5, 0.0  ;;  %s176_s21 = scalar_lea.vmem %s117_s1, 128  ;;  %p181_p11 = scmp.lt.s32.totalorder %s117_s1, %s117_s1 }
  0x1f   :  { %v69_v8 = vmin.f32 %v67_v3, 1.0  ;;  %v70_v9 = vmin.f32 %v68_v4, 1.0  ;;  %p177_p10 = scmp.ne.s32.totalorder %s117_s1, %s176_s21  ;;  %p182_p12 = scmp.lt.s32.totalorder %s176_s21, %s176_s21 }
  0x20   :  { %v75_v10 = vmin.f32 %v73_v6, 1.0  ;;  %v76_v11 = vmin.f32 %v74_v7, 1.0 }
  0x21   :  { %p183_p13 = por %p182_p12, %p181_p11 }
  0x22   :  { %v77_v12 = vsub.f32 %v69_v8, %v75_v10  ;;  %v78_v13 = vsub.f32 %v70_v9, %v76_v11 }
  0x23   :  { %p184_p0 = pnand %p183_p13, %p177_p10 }
  0x24   :  { %v79_v14 = vmul.f32 %v77_v12, %v77_v12  ;;  %v80_v15 = vmul.f32 %v78_v13, %v78_v13 }
  0x26   :  { %v89_v16 = vadd.f32 %v80_v15, %v79_v14 }
  0x28   :  { %91 = vst [vmem:[#allocation7] sm:$0xff] %v89_v16 }
  0x29   :  { %187 = shalt.err (!%p184_p0)
}
  0x2a   :  { %119 = dma.vmem_to_hbm [thread:$0]  %s117_s1, 128, %s233_s2, [#allocation4]  }
  0x2b   :  { %200 = dma.done.wait [#allocation4], 128  }
  0x2c   :  { %201 = vsyncadd [#allocation4], 4294967168 }
  0x2d   :  { %123 = vsyncpa [#allocation3], 1 }
  0x2e   :  { %124 = vsyncpa [#allocation6], 1 }
  0x2f   :  { %125 = vsyncpa [#allocation4], 1 }

</bundles_post_ra>
